<compile_context>
chip_gen: v7x
topology: tpu7x:2x2x1
jax: 0.10.0
libtpu: 0.0.40
codegen_flags: <defaults>
</compile_context>

<pallas_src>
import functools
import math

import jax
import jax.numpy as jnp
from jax.experimental import pallas as pl
from jax.experimental.pallas import tpu as pltpu


def _contrastive_loss_kernel(x_rows_ref, x_cols_ref, pos_ref, loss_ref, acc_ref,
                             *, tau, normalize, block_rows, block_cols):
    """One (row-block, col-block) tile of the (2B, 2B) similarity matrix.

    x_rows_ref: (TR, D)  pre-normalized / pre-scaled row tile
    x_cols_ref: (TC, D)  pre-normalized / pre-scaled column tile
    pos_ref:    (TR, 1)  positive-pair logits for this row tile (f32)
    loss_ref:   (TR, 1)  per-row loss, written at the last column block
    acc_ref:    (TR, 1)  f32 row-sum accumulator (VMEM scratch)
    """
    c = pl.program_id(1)

    @pl.when(c == 0)
    def _():
        acc_ref[...] = jnp.zeros_like(acc_ref)

    # sim / tau for this tile (1/sqrt(tau) was folded into both operands in the
    # wrapper).  Contraction over the lane (D) axis of BOTH operands -> no
    # materialized transpose.  Accumulate in f32 on the MXU.
    sim = jax.lax.dot_general(
        x_rows_ref[...], x_cols_ref[...],
        dimension_numbers=(((1,), (1,)), ((), ())),
        preferred_element_type=jnp.float32)                       # (TR, TC)

    if normalize:
        # Remove the self-similarity term by masking the true diagonal entry
        # (one VPU compare+select that hides under the EUP exp) instead of
        # subtracting the analytic exp(1/tau), which can cancel to <= 0.
        r = pl.program_id(0)
        row_ids = r * block_rows + jax.lax.broadcasted_iota(jnp.int32, sim.shape, 0)
        col_ids = c * block_cols + jax.lax.broadcasted_iota(jnp.int32, sim.shape, 1)
        sim = jnp.where(row_ids == col_ids, -1e30, sim)           # exp -> 0

    acc_ref[...] += jnp.sum(jnp.exp(sim), axis=-1, keepdims=True)

    @pl.when(c == pl.num_programs(1) - 1)
    def _():
        denom = acc_ref[...]
        if not normalize:
            # The reference subtracts exp(1/tau) regardless of the actual
            # (un-normalized) diagonal value; keep those exact semantics.
            denom = denom - math.exp(1.0 / tau)
        # loss = -log(match / (row_sum - self_term)) = log(denom) - pos_logit
        loss_ref[...] = jnp.log(denom) - pos_ref[...]


def _pick_block(total, candidates):
    for cand in candidates:
        if cand <= total and total % cand == 0:
            return cand
    return total


def _vmem_bytes(tr, tc, d, operand_bytes):
    operands = 2 * (tr + tc) * d * operand_bytes     # double-buffered tiles
    small = 2 * (tr * 4) * 2 + tr * 4                # pos + out blocks + acc
    intermediates = 2 * tr * tc * 4                  # f32 sim + exp(sim)
    return operands + small + intermediates


def contrastive_loss(xi, xj, tau=1.0, normalize=True, *,
                     block_rows=None, block_cols=None,
                     use_bf16_matmul=None, vmem_limit_bytes=None,
                     vmem_budget_bytes=20 * 1024 * 1024):
    """Pallas TPU implementation of the PyTorch `contrastive_loss.forward`."""
    assert xi.shape == xj.shape and xi.ndim == 2
    B, D = xi.shape
    two_b = 2 * B
    inv_sqrt_tau = 1.0 / math.sqrt(float(tau))

    # ---- Hoisted preprocessing: ONE fused XLA pass over (2B, D) ------------
    x = jnp.concatenate([xi, xj], axis=0).astype(jnp.float32)       # (2B, D)
    if normalize:
        # Pre-normalizing rows replaces the ||x_i||*||x_j|| outer-product
        # divide.  (Clamp on the squared norm ~ the reference's 1e-16 clamp on
        # the norm product; only differs for degenerate all-zero rows.)
        inv_norm = jax.lax.rsqrt(
            jnp.maximum(jnp.sum(x * x, axis=-1, keepdims=True), 1e-32))
        xs = x * (inv_norm * inv_sqrt_tau)
    else:
        xs = x * inv_sqrt_tau

    # Positive-pair logits: partner of row g is (g + B) mod 2B, so the (2B,1)
    # vector is [p, p] with p = rowsum(xi_hat * xj_hat) / tau (tau folded in).
    pos_half = jnp.sum(xs[:B] * xs[B:], axis=-1, keepdims=True)     # (B, 1)
    pos = jnp.concatenate([pos_half, pos_half], axis=0)             # (2B, 1)

    if use_bf16_matmul is None:
        use_bf16_matmul = (xi.dtype == jnp.bfloat16)
    operand_dtype = jnp.bfloat16 if use_bf16_matmul else jnp.float32
    operand_bytes = 2 if use_bf16_matmul else 4
    xs_op = xs.astype(operand_dtype)

    # ---- Tile selection -----------------------------------------------------
    if block_rows is None:
        # Prefer multiples of 256 (v6e/v7x MXU passes) over 512, then smaller
        # multiples of 8; otherwise a single full block.
        block_rows = _pick_block(two_b, (256, 512, 128, 64, 32, 16, 8))
    assert two_b % block_rows == 0
    assert block_rows % 8 == 0 or block_rows == two_b

    if block_cols is None:
        block_cols = two_b
        for cand in (two_b, 4096, 2048, 1024, 512, 256, 128, 64, 32, 16, 8):
            if cand <= two_b and two_b % cand == 0:
                block_cols = cand
                if _vmem_bytes(block_rows, cand, D, operand_bytes) <= vmem_budget_bytes:
                    break
    assert two_b % block_cols == 0
    assert block_cols % 8 == 0 or block_cols == two_b

    num_row_blocks = two_b // block_rows
    num_col_blocks = two_b // block_cols

    # v5e's default scoped VMEM is ~16 MiB: always pass an explicit limit.
    if vmem_limit_bytes is None:
        est = _vmem_bytes(block_rows, block_cols, D, operand_bytes)
        vmem_limit_bytes = int(min(max(2 * est, 8 * 1024 * 1024),
                                   56 * 1024 * 1024))

    kernel = functools.partial(
        _contrastive_loss_kernel, tau=float(tau), normalize=bool(normalize),
        block_rows=block_rows, block_cols=block_cols)

    per_row = pl.pallas_call(
        kernel,
        out_shape=jax.ShapeDtypeStruct((two_b, 1), jnp.float32),
        grid_spec=pltpu.PrefetchScalarGridSpec(
            num_scalar_prefetch=0,
            grid=(num_row_blocks, num_col_blocks),        # reduction axis last
            in_specs=[
                pl.BlockSpec((block_rows, D), lambda r, c: (r, 0)),  # rows
                pl.BlockSpec((block_cols, D), lambda r, c: (c, 0)),  # columns
                pl.BlockSpec((block_rows, 1), lambda r, c: (r, 0)),  # pos logit
            ],
            out_specs=pl.BlockSpec((block_rows, 1), lambda r, c: (r, 0)),
            scratch_shapes=[pltpu.VMEM((block_rows, 1), jnp.float32)],
        ),
        compiler_params=pltpu.CompilerParams(
            dimension_semantics=("parallel", "arbitrary"),  # megacore shard rows
            vmem_limit_bytes=int(vmem_limit_bytes),
        ),
    )(xs_op, xs_op, pos)

    # Tiny (2B-element) final reduction outside the kernel.
    return jnp.mean(per_row)


def _reference(xi, xj, tau=1.0, normalize=True):
    """Pure-JAX mirror of the PyTorch module (HIGHEST precision matmul)."""
    xi = xi.astype(jnp.float32)
    xj = xj.astype(jnp.float32)
    x = jnp.concatenate([xi, xj], axis=0)
    sim = jnp.einsum("id,jd->ij", x, x, precision=jax.lax.Precision.HIGHEST)
    if normalize:
        n = jnp.linalg.norm(x, axis=1, keepdims=True)
        sim = sim / jnp.maximum(n @ n.T, 1e-16)
    sim = jnp.exp(sim / tau)
    if normalize:
        d = jnp.linalg.norm(xi, axis=1) * jnp.linalg.norm(xj, axis=1)
        match = jnp.exp(jnp.sum(xi * xj, axis=-1) / d / tau)
    else:
        match = jnp.exp(jnp.sum(xi * xj, axis=-1) / tau)
    match = jnp.concatenate([match, match], axis=0)
    norm_sum = math.exp(1.0 / tau)
    return jnp.mean(-jnp.log(match / (jnp.sum(sim, axis=-1) - norm_sum)))


if __name__ == "__main__":
    key = jax.random.PRNGKey(0)
    k1, k2, k3, k4 = jax.random.split(key, 4)

    # Small case at the module's natural scale (single (16, 16) tile).
    B, D = 8, 32
    xi = jax.random.normal(k1, (B, D), dtype=jnp.float32)
    xj = jax.random.normal(k2, (B, D), dtype=jnp.float32)
    # Tolerances allow for the TPU MXU's default f32-matmul precision.
    for tau, normalize in ((1.0, True), (0.5, True), (1.0, False)):
        got = jax.block_until_ready(
            contrastive_loss(xi, xj, tau=tau, normalize=normalize))
        ref = _reference(xi, xj, tau=tau, normalize=normalize)
        assert jnp.isfinite(got), (tau, normalize, got)
        assert jnp.allclose(got, ref, rtol=1e-2, atol=1e-2), (tau, normalize, got, ref)

    # Larger case exercising the 2-D (row, column) grid, the accumulator
    # reset/finalize and the block-wise diagonal mask.
    B2, D2 = 64, 128
    xi2 = jax.random.normal(k3, (B2, D2), dtype=jnp.float32)
    xj2 = jax.random.normal(k4, (B2, D2), dtype=jnp.float32)
    got2 = jax.block_until_ready(
        contrastive_loss(xi2, xj2, tau=0.5, normalize=True,
                         block_rows=32, block_cols=32))
    ref2 = _reference(xi2, xj2, tau=0.5, normalize=True)
    assert jnp.allclose(got2, ref2, rtol=1e-2, atol=1e-2), (got2, ref2)

    # Flag-gated bf16 MXU path for f32 inputs (looser tolerance).
    got3 = jax.block_until_ready(
        contrastive_loss(xi2, xj2, tau=0.5, normalize=True,
                         use_bf16_matmul=True))
    assert jnp.allclose(got3, ref2, rtol=5e-2, atol=5e-2), (got3, ref2)

    print("KERNEL_OK")
</pallas_src>

<mosaic_0001>
module attributes {stable_mosaic.version = 11 : i64} {
  func.func @_contrastive_loss_kernel(%arg0: i32, %arg1: i32, %arg2: memref<16x32xf32, #tpu.memory_space<vmem>>, %arg3: memref<16x32xf32, #tpu.memory_space<vmem>>, %arg4: memref<16x1xf32, #tpu.memory_space<vmem>>, %arg5: memref<16x1xf32, #tpu.memory_space<vmem>>, %arg6: memref<16x1xf32, #tpu.memory_space<vmem>>) attributes {dimension_semantics = [#tpu.dimension_semantics<parallel>, #tpu.dimension_semantics<arbitrary>], iteration_bounds = array<i64: 1, 1>, scalar_prefetch = 0 : i64, scratch_operands = 1 : i64, tpu.core_type = #tpu.core_type<tc>, window_params = [{transform_indices = @transform_0, window_bounds = array<i64: 16, 32>}, {transform_indices = @transform_1, window_bounds = array<i64: 16, 32>}, {transform_indices = @transform_2, window_bounds = array<i64: 16, 1>}, {transform_indices = @transform_3, window_bounds = array<i64: 16, 1>}]} {
    %c0_i32 = arith.constant 0 : i32
    %0 = arith.cmpi eq, %arg1, %c0_i32 : i32
    %1 = arith.extui %0 : i1 to i32
    %c0_i32_0 = arith.constant 0 : i32
    %2 = arith.cmpi ne, %1, %c0_i32_0 : i32
    scf.if %2 {
      %cst_13 = arith.constant 0.000000e+00 : f32
      %26 = vector.broadcast %cst_13 : f32 to vector<16x1xf32>
      %c0_14 = arith.constant 0 : index
      %c0_15 = arith.constant 0 : index
      %27 = vector.load %arg6[%c0_14, %c0_15] : memref<16x1xf32, #tpu.memory_space<vmem>>, vector<16x1xf32>
      tpu.vector_store %arg6[%c0_14, %c0_15], %26 {strides = array<i32>} : memref<16x1xf32, #tpu.memory_space<vmem>>, vector<16x1xf32>,
    } else {
    }
    %c0 = arith.constant 0 : index
    %c0_1 = arith.constant 0 : index
    %3 = vector.load %arg2[%c0, %c0_1] : memref<16x32xf32, #tpu.memory_space<vmem>>, vector<16x32xf32>
    %c0_2 = arith.constant 0 : index
    %c0_3 = arith.constant 0 : index
    %4 = vector.load %arg3[%c0_2, %c0_3] : memref<16x32xf32, #tpu.memory_space<vmem>>, vector<16x32xf32>
    %cst = arith.constant dense<0.000000e+00> : vector<16x16xf32>
    %5 = tpu.matmul %3, %4, %cst {dimension_numbers = #tpu.dot_dimension_numbers<[1], [1], [0], [0], [0, 0, 1, 0], [], []>} : vector<16x32xf32>, vector<16x32xf32>, vector<16x16xf32> -> vector<16x16xf32>
    %c16_i32 = arith.constant 16 : i32
    %6 = arith.muli %arg0, %c16_i32 : i32
    %7 = tpu.iota {dimensions = array<i32: 0>} : vector<16x16xi32>
    %8 = vector.broadcast %6 : i32 to vector<16x16xi32>
    %9 = arith.addi %8, %7 : vector<16x16xi32>
    %c16_i32_4 = arith.constant 16 : i32
    %10 = arith.muli %arg1, %c16_i32_4 : i32
    %11 = tpu.iota {dimensions = array<i32: 1>} : vector<16x16xi32>
    %12 = vector.broadcast %10 : i32 to vector<16x16xi32>
    %13 = arith.addi %12, %11 : vector<16x16xi32>
    %14 = arith.cmpi eq, %9, %13 : vector<16x16xi32>
    %cst_5 = arith.constant -1.000000e+30 : f32
    %15 = vector.broadcast %cst_5 : f32 to vector<16x16xf32>
    %16 = arith.select %14, %15, %5 : vector<16x16xi1>, vector<16x16xf32>
    %c0_6 = arith.constant 0 : index
    %c0_7 = arith.constant 0 : index
    %17 = vector.load %arg6[%c0_6, %c0_7] : memref<16x1xf32, #tpu.memory_space<vmem>>, vector<16x1xf32>
    %18 = math.exp %16 : vector<16x16xf32>
    %cst_8 = arith.constant dense<0.000000e+00> : vector<16xf32>
    %19 = vector.multi_reduction <add>, %18, %cst_8 [1] : vector<16x16xf32> to vector<16xf32>
    %20 = vector.shape_cast %19 : vector<16xf32> to vector<16x1xf32>
    %21 = arith.addf %17, %20 : vector<16x1xf32>
    %c0_9 = arith.constant 0 : index
    %c0_10 = arith.constant 0 : index
    %22 = vector.load %arg6[%c0_9, %c0_10] : memref<16x1xf32, #tpu.memory_space<vmem>>, vector<16x1xf32>
    tpu.vector_store %arg6[%c0_9, %c0_10], %21 {strides = array<i32>} : memref<16x1xf32, #tpu.memory_space<vmem>>, vector<16x1xf32>,
    %c0_i32_11 = arith.constant 0 : i32
    %23 = arith.cmpi eq, %arg1, %c0_i32_11 : i32
    %24 = arith.extui %23 : i1 to i32
    %c0_i32_12 = arith.constant 0 : i32
    %25 = arith.cmpi ne, %24, %c0_i32_12 : i32
    scf.if %25 {
      %c0_13 = arith.constant 0 : index
      %c0_14 = arith.constant 0 : index
      %26 = vector.load %arg6[%c0_13, %c0_14] : memref<16x1xf32, #tpu.memory_space<vmem>>, vector<16x1xf32>
      %27 = math.log %26 : vector<16x1xf32>
      %c0_15 = arith.constant 0 : index
      %c0_16 = arith.constant 0 : index
      %28 = vector.load %arg4[%c0_15, %c0_16] : memref<16x1xf32, #tpu.memory_space<vmem>>, vector<16x1xf32>
      %29 = arith.subf %27, %28 : vector<16x1xf32>
      %c0_17 = arith.constant 0 : index
      %c0_18 = arith.constant 0 : index
      %30 = vector.load %arg5[%c0_17, %c0_18] : memref<16x1xf32, #tpu.memory_space<vmem>>, vector<16x1xf32>
      tpu.vector_store %arg5[%c0_17, %c0_18], %29 {strides = array<i32>} : memref<16x1xf32, #tpu.memory_space<vmem>>, vector<16x1xf32>,
    } else {
    }
    return
  }
  func.func @transform_0(%arg0: i32, %arg1: i32) -> (i32, i32) {
    %c0_i32 = arith.constant 0 : i32
    %c0_i32_0 = arith.constant 0 : i32
    return %arg0, %c0_i32 : i32, i32
  }
  func.func @transform_1(%arg0: i32, %arg1: i32) -> (i32, i32) {
    %c0_i32 = arith.constant 0 : i32
    %c0_i32_0 = arith.constant 0 : i32
    return %arg1, %c0_i32 : i32, i32
  }
  func.func @transform_2(%arg0: i32, %arg1: i32) -> (i32, i32) {
    %c0_i32 = arith.constant 0 : i32
    %c0_i32_0 = arith.constant 0 : i32
    return %arg0, %c0_i32 : i32, i32
  }
  func.func @transform_3(%arg0: i32, %arg1: i32) -> (i32, i32) {
    %c0_i32 = arith.constant 0 : i32
    %c0_i32_0 = arith.constant 0 : i32
    return %arg0, %c0_i32 : i32, i32
  }
}

</mosaic_0001>

<bundles_post_ra>
// kernel: tpu_custom_call.1
= control target key start
LH: loop header
LB: loop body
LE: loop exit
PB: predicated region body
PF: predicated region fallthrough
CT: control target
= control target key end

     0   :  { %8 = vsyncpa [#allocation4], 0  ;;  %s238_s12 = smov [#allocation3]   ;;  %s298_s0 = inlined_call_operand.vmem [shape: f32[16,32], index: 0, kind: input, shape index: {}]   ;;  %s299_s1 = inlined_call_operand.hbm [shape: f32[16,32], index: 1, kind: input, shape index: {}]   ;;  %s300_s2 = inlined_call_operand.vmem [shape: f32[16,1], index: 2, kind: input, shape index: {}]   ;;  %s301_s3 = inlined_call_operand.vmem [shape: f32[16,1], index: 3, kind: output, shape index: {}]  }
   0x1   :  { %s16_s13 = sshll.u32 %s238_s12, 4  ;;  %s214_s16 = scalar_lea.hbm %s299_s1, 256  ;;  %s17_s13 = int_to_ptr.vmem [resolvable:$true] %s16_s13 }
   0x2   :  { %p215_p0 = scmp.ne.s32.totalorder %s299_s1, %s214_s16  ;;  %p218_p1 = scmp.lt.u32.totalorder %s214_s16, %s299_s1 }
   0x4   :  { %p220_p2 = pnand %p218_p1, %p215_p0 }
   0x6   :  { %223 = shalt.err (!%p220_p2)
}
   0x7   :  { %s224_s21 = scalar_lea.vmem %s17_s13, 256  ;;  %p229_p4 = scmp.lt.s32.totalorder %s17_s13, %s17_s13 }
   0x8   :  { %p225_p3 = scmp.ne.s32.totalorder %s17_s13, %s224_s21  ;;  %p230_p5 = scmp.lt.s32.totalorder %s224_s21, %s224_s21 }
   0xa   :  { %p231_p6 = por %p230_p5, %p229_p4 }
   0xc   :  { %p232_p7 = pnand %p231_p6, %p225_p3 }
   0xe   :  { %235 = shalt.err (!%p232_p7)
}
   0xf   :  { %s239_s22 = smov 128   ;;  %s240_s23 = smov 8  }
  0x10   :  { %22 = dma.hbm_to_vmem [thread:$0]  %s299_s1, 256, %s17_s13, [#allocation4], %s239_s22, %s239_s22, %s240_s23  }
  0x11   :  { %236 = dma.done.wait [#allocation4], 256  }
  0x12   :  { %237 = vsyncadd [#allocation4], 4294967040  ;;  %vm39_vm0 = vcmask 261120   ;;  %v37_v0 = vld [vmem:[#allocation3] sm:$0xff]  ;;  %v38_v1 = vld [vmem:[#allocation3 + $0x8] sm:$0xff]  ;;  %vm32_vm2 = vcmask 7168   ;;  %v128_v6 = vlaneseq }
  0x13   :  { %vm197_vm1 = vmpackc.low %vm39_vm0, %vm39_vm0  ;;  %v35_v2 = vld [vmem:[%s298_s0] sm:$0xff]  ;;  %v196_v3 = vpack.c.bf16 %v38_v1, %v37_v0  ;;  %v36_v4 = vld [vmem:[%s298_s0 + $0x8] sm:$0xff]  ;;  %v241_v5 = vmov 0.0   ;;  %vm149_vm5 = vcmask 130048  }
  0x14   :  { %193 = vmatprep.mubr.msk.f32.mxu0 %vm39_vm0, %v35_v2  ;;  %33 = vst.msk [vmem:[#allocation2] sm:$0xff] %vm32_vm2, %v241_v5  ;;  %34 = vst.msk [vmem:[#allocation2 + $0x8] sm:$0xff] %vm32_vm2, %v241_v5  ;;  %v129_v7 = vshrl.u32 %v128_v6, 7  ;;  %v136_v9 = vand.u32 127, %v128_v6  ;;  %v170_v29 = vld [vmem:[%s300_s2] sm:$0xff]  ;;  %v171_v33 = vld [vmem:[%s300_s2 + $0x8] sm:$0xff] }
  0x15   :  { %198 = vmatprep.subr.msk.bf16.mxu0 %vm197_vm1, %v196_v3 }
  0x16   :  { %201 = vmatpush3.bf16.xpose.msk.msra.mxu0 %vm197_vm1, %v196_v3  ;;  %v130_v8 = vadd.s32 8, %v129_v7  ;;  %vm139_vm4 = vcmp.eq.s32.totalorder %v129_v7, %v136_v9 }
  0x18   :  { %vm140_vm3 = vcmp.eq.s32.totalorder %v130_v8, %v136_v9 }
  0x1b   :  { %v143_v20 = vld [vmem:[#allocation2] sm:$0xff]  ;;  %v144_v23 = vld [vmem:[#allocation2 + $0x8] sm:$0xff] }
  0x1d   :  { %194 = vmatmul.mubr.msk.f32.vlgmr.msra.gmra.mrb[0].mxu0 %vm39_vm0, %v36_v4 }
  0xf0   :  { %v195_v10 = vpop.f32.mrb[0].mxu0 }
  0xf1   :  { %v142_v11 = vsel %vm140_vm3, -1e+30, %v195_v10  ;;  %v118_v12 = vpop.f32.mrb[1].mxu0 }
  0xf2   :  { %v141_v13 = vsel %vm139_vm4, -1e+30, %v118_v12  ;;  %v147_v14 = vmul.f32 1.442695, %v142_v11 }
  0xf3   :  { %v145_v15 = vmul.f32 1.442695, %v141_v13 }
  0xf5   :  { %206 = vpow2.f32 %v145_v15 }
  0xf6   :  { %208 = vpow2.f32 %v147_v14 }
  0xff   :  { %v207_v16 = vpop.eup %206 }
 0x100   :  { %v150_v17 = vsel %vm149_vm5, %v207_v16, 0.0  ;;  %v209_v18 = vpop.eup %208 }
 0x101   :  { %151 = vadd.xlane.f32.xlu0 %v150_v17  ;;  %v153_v19 = vsel %vm149_vm5, %v209_v18, 0.0 }
 0x105   :  { %154 = vadd.xlane.f32.xlu0 %v153_v19 }
 0x18e   :  { %v152_v21 = vpop.xlane.xlu0 %151 }
 0x18f   :  { %v156_v22 = vadd.f32 %v152_v21, %v143_v20 }
 0x191   :  { %159 = vst.msk [vmem:[#allocation2] sm:$0xff] %vm32_vm2, %v156_v22 }
 0x192   :  { %v155_v24 = vpop.xlane.xlu0 %154 }
 0x193   :  { %v157_v25 = vadd.f32 %v155_v24, %v144_v23 }
 0x195   :  { %160 = vst.msk [vmem:[#allocation2 + $0x8] sm:$0xff] %vm32_vm2, %v157_v25 }
 0x198   :  { %v164_v26 = vld [vmem:[#allocation2] sm:$0xff] }
 0x199   :  { %210 = vlog2.f32 %v164_v26 }
 0x19c   :  { %v165_v27 = vld [vmem:[#allocation2 + $0x8] sm:$0xff] }
 0x19d   :  { %212 = vlog2.f32 %v165_v27 }
 0x1a3   :  { %v211_v28 = vpop.eup %210 }
 0x1a4   :  { %v167_v30 = vmul.f32 0.6931472, %v211_v28 }
 0x1a6   :  { %v172_v31 = vsub.f32 %v167_v30, %v170_v29 }
 0x1a7   :  { %v213_v32 = vpop.eup %212 }
 0x1a8   :  { %174 = vst.msk [vmem:[%s301_s3] sm:$0xff] %vm32_vm2, %v172_v31  ;;  %v169_v34 = vmul.f32 0.6931472, %v213_v32 }
 0x1aa   :  { %v173_v35 = vsub.f32 %v169_v34, %v171_v33 }
 0x1ac   :  { %175 = vst.msk [vmem:[%s301_s3 + $0x8] sm:$0xff] %vm32_vm2, %v173_v35 }
 0x1ad   :  { %180 = vsyncpa [#allocation4], 1 }

</bundles_post_ra>
